<compile_context>
chip_gen: v5e
topology: v5e:2x2
jax: 0.10.0
libtpu: 0.0.40
codegen_flags: <defaults>
</compile_context>

<pallas_src>
import functools
import math

import jax
import jax.numpy as jnp
from jax.experimental import pallas as pl
from jax.experimental.pallas import tpu as pltpu


def _ema_kernel(beta, log_one_minus_beta, x_ref, len_ref, o_ref):
    """Closed-form EMA over one lane-dense tile.

    x_ref:   (L, TB) f32 -- history step on sublanes, batch rows on lanes
    len_ref: (1, TB) f32 -- valid history length per batch row (>= 1)
    o_ref:   (1, TB) f32 -- EMA at the last valid step of each row
    """
    x = x_ref[...]
    L, TB = x.shape
    v = len_ref[...]                                            # (1, TB)

    # Per-step weights, fully vectorized (VPU + EUP), no sequential recurrence.
    j = jax.lax.broadcasted_iota(jnp.int32, (L, TB), 0).astype(jnp.float32)
    k = jnp.maximum(v - 1.0 - j, 0.0)                           # exponent (L, TB)
    decay = jnp.exp(k * log_one_minus_beta)                     # (1-beta)^(v-1-j)
    w = jnp.where(j == 0.0, decay, beta * decay)                # first step: no beta
    w = jnp.where(j < v, w, 0.0)                                # mask invalid steps

    # Sublane reduce -> lane-dense (1, TB) output row.
    o_ref[...] = jnp.sum(w * x, axis=0, keepdims=True)


def module_pop_history_forward(pop_history, valid_pop_len, beta, *, lane_tile=512):
    """ModulePopHistory.forward.

    pop_history:   (B, L) float   -- padded popularity histories
    valid_pop_len: (B,)   int     -- number of valid steps per row (>= 1)
    beta:          python float in (0, 1)
    returns:       (B, 1) float32
    """
    assert 0.0 < beta < 1.0, "beta must be in (0, 1)"
    B, L = pop_history.shape

    # Lane tile over the batch axis: multiple of 128, a single tile for small B.
    if B <= lane_tile:
        tb = max(128, pl.cdiv(B, 128) * 128)
    else:
        tb = lane_tile
    b_pad = pl.cdiv(B, tb) * tb

    # Wrapper-side layout plumbing: batch on lanes, history on sublanes.
    x = jnp.asarray(pop_history, jnp.float32).T                 # (L, B)
    x = jnp.pad(x, ((0, 0), (0, b_pad - B)))
    lens = jnp.asarray(valid_pop_len, jnp.float32).reshape(1, B)
    lens = jnp.pad(lens, ((0, 0), (0, b_pad - B)), constant_values=1.0)

    kernel = functools.partial(
        _ema_kernel, float(beta), math.log(1.0 - float(beta)))

    out = pl.pallas_call(
        kernel,
        out_shape=jax.ShapeDtypeStruct((1, b_pad), jnp.float32),
        grid=(b_pad // tb,),
        in_specs=[
            pl.BlockSpec((L, tb), lambda i: (0, i)),            # history slab
            pl.BlockSpec((1, tb), lambda i: (0, i)),            # valid lengths
        ],
        out_specs=pl.BlockSpec((1, tb), lambda i: (0, i)),      # lane-dense output
        compiler_params=pltpu.CompilerParams(
            dimension_semantics=("parallel",)),
    )(x, lens)

    # Padded tail columns are garbage-by-construction: slice before returning.
    return out[0, :B].reshape(B, 1)


def module_pop_history_reference(pop_history, valid_pop_len, beta):
    """Pure-numpy per-row EMA recurrence (intended semantics of ema())."""
    import numpy as np
    ph = np.asarray(pop_history, np.float32)
    vl = np.asarray(valid_pop_len)
    B = ph.shape[0]
    out = np.zeros((B, 1), np.float32)
    for i in range(B):
        e = ph[i, 0]
        for j in range(1, int(vl[i])):
            e = np.float32(beta) * ph[i, j] + np.float32(1.0 - beta) * e
        out[i, 0] = e
    return out


if __name__ == "__main__":
    # Small shapes consistent with the module: pop_history_length=8, batch=8.
    B = 8        # batch
    L = 8        # config.pop_history_length
    beta = 0.8   # config.beta

    key = jax.random.PRNGKey(0)
    k_hist, k_len = jax.random.split(key)
    pop_history = jax.random.normal(k_hist, (B, L), dtype=jnp.float32)
    valid_pop_len = jax.random.randint(k_len, (B,), 1, L + 1)   # in [1, L]

    out = module_pop_history_forward(pop_history, valid_pop_len, beta)
    out = jax.block_until_ready(out)

    ref = module_pop_history_reference(pop_history, valid_pop_len, beta)
    assert out.shape == (B, 1), out.shape
    assert jnp.allclose(out, ref, atol=1e-5, rtol=1e-5), (out, ref)

    print("KERNEL_OK")
</pallas_src>

<mosaic_0001>
module attributes {stable_mosaic.version = 11 : i64} {
  func.func @_ema_kernel(%arg0: i32, %arg1: memref<8x128xf32, #tpu.memory_space<vmem>>, %arg2: memref<1x128xf32, #tpu.memory_space<vmem>>, %arg3: memref<1x128xf32, #tpu.memory_space<vmem>>) attributes {dimension_semantics = [#tpu.dimension_semantics<parallel>], iteration_bounds = array<i64: 1>, scalar_prefetch = 0 : i64, scratch_operands = 0 : i64, tpu.core_type = #tpu.core_type<tc>, window_params = [{transform_indices = @transform_0, window_bounds = array<i64: 8, 128>}, {transform_indices = @transform_1, window_bounds = array<i64: 1, 128>}, {transform_indices = @transform_2, window_bounds = array<i64: 1, 128>}]} {
    %c0 = arith.constant 0 : index
    %c0_0 = arith.constant 0 : index
    %0 = vector.load %arg1[%c0, %c0_0] : memref<8x128xf32, #tpu.memory_space<vmem>>, vector<8x128xf32>
    %c0_1 = arith.constant 0 : index
    %c0_2 = arith.constant 0 : index
    %1 = vector.load %arg2[%c0_1, %c0_2] : memref<1x128xf32, #tpu.memory_space<vmem>>, vector<1x128xf32>
    %2 = tpu.iota {dimensions = array<i32: 0>} : vector<8x128xi32>
    %3 = arith.sitofp %2 : vector<8x128xi32> to vector<8x128xf32>
    %cst = arith.constant 1.000000e+00 : f32
    %4 = vector.broadcast %cst : f32 to vector<1x128xf32>
    %5 = arith.subf %1, %4 : vector<1x128xf32>
    %6 = vector.broadcast %5 : vector<1x128xf32> to vector<8x128xf32>
    %7 = arith.subf %6, %3 : vector<8x128xf32>
    %cst_3 = arith.constant 0.000000e+00 : f32
    %8 = vector.broadcast %cst_3 : f32 to vector<8x128xf32>
    %9 = arith.maximumf %7, %8 : vector<8x128xf32>
    %cst_4 = arith.constant -1.60943794 : f32
    %10 = vector.broadcast %cst_4 : f32 to vector<8x128xf32>
    %11 = arith.mulf %9, %10 : vector<8x128xf32>
    %12 = math.exp %11 : vector<8x128xf32>
    %cst_5 = arith.constant 0.000000e+00 : f32
    %13 = vector.broadcast %cst_5 : f32 to vector<8x128xf32>
    %14 = arith.cmpf oeq, %3, %13 : vector<8x128xf32>
    %cst_6 = arith.constant 8.000000e-01 : f32
    %15 = vector.broadcast %cst_6 : f32 to vector<8x128xf32>
    %16 = arith.mulf %15, %12 : vector<8x128xf32>
    %17 = arith.select %14, %12, %16 : vector<8x128xi1>, vector<8x128xf32>
    %18 = vector.broadcast %1 : vector<1x128xf32> to vector<8x128xf32>
    %19 = arith.cmpf olt, %3, %18 : vector<8x128xf32>
    %cst_7 = arith.constant 0.000000e+00 : f32
    %20 = vector.broadcast %cst_7 : f32 to vector<8x128xf32>
    %21 = arith.select %19, %17, %20 : vector<8x128xi1>, vector<8x128xf32>
    %22 = arith.mulf %21, %0 : vector<8x128xf32>
    %cst_8 = arith.constant dense<0.000000e+00> : vector<128xf32>
    %23 = vector.multi_reduction <add>, %22, %cst_8 [0] : vector<8x128xf32> to vector<128xf32>
    %24 = vector.shape_cast %23 : vector<128xf32> to vector<1x128xf32>
    %c0_9 = arith.constant 0 : index
    %c0_10 = arith.constant 0 : index
    %25 = vector.load %arg3[%c0_9, %c0_10] : memref<1x128xf32, #tpu.memory_space<vmem>>, vector<1x128xf32>
    tpu.vector_store %arg3[%c0_9, %c0_10], %24 {strides = array<i32>} : memref<1x128xf32, #tpu.memory_space<vmem>>, vector<1x128xf32>,
    return
  }
  func.func @transform_0(%arg0: i32) -> (i32, i32) {
    %c0_i32 = arith.constant 0 : i32
    %c0_i32_0 = arith.constant 0 : i32
    return %c0_i32, %arg0 : i32, i32
  }
  func.func @transform_1(%arg0: i32) -> (i32, i32) {
    %c0_i32 = arith.constant 0 : i32
    %c0_i32_0 = arith.constant 0 : i32
    return %c0_i32, %arg0 : i32, i32
  }
  func.func @transform_2(%arg0: i32) -> (i32, i32) {
    %c0_i32 = arith.constant 0 : i32
    %c0_i32_0 = arith.constant 0 : i32
    return %c0_i32, %arg0 : i32, i32
  }
}

</mosaic_0001>

<bundles_post_ra>
// kernel: tpu_custom_call.1
= control target key start
LH: loop header
LB: loop body
LE: loop exit
PB: predicated region body
PF: predicated region fallthrough
CT: control target
= control target key end

     0   :  { %7 = vsyncpa [#allocation3], 0  ;;  %s200_s0 = inlined_call_operand.hbm [shape: f32[8,128], index: 0, kind: input, shape index: {}]   ;;  %s201_s1 = inlined_call_operand.hbm [shape: f32[1,128], index: 1, kind: input, shape index: {}]   ;;  %s202_s2 = inlined_call_operand.hbm [shape: f32[1,128], index: 2, kind: output, shape index: {}]  }
   0x1   :  { %8 = vsyncpa [#allocation6], 0 }
   0x2   :  { %9 = vsyncpa [#allocation4], 0  ;;  %s15_s11 = sshll.u32 %s200_s0, 4  ;;  %s173_s12 = smov [#allocation2]   ;;  %s16_s11 = int_to_ptr.hbm [resolvable:$true] %s15_s11 }
   0x3   :  { %s17_s13 = sshll.u32 %s173_s12, 4  ;;  %s26_s16 = sshll.u32 %s201_s1, 4  ;;  %s18_s13 = int_to_ptr.vmem [resolvable:$true] %s17_s13  ;;  %s27_s16 = int_to_ptr.hbm [resolvable:$true] %s26_s16 }
   0x4   :  { %20 = dma.hbm_to_vmem [thread:$0]  %s16_s11, 128, %s18_s13, [#allocation3]  }
   0x5   :  { %s174_s17 = smov [#allocation5]  }
   0x6   :  { %s28_s18 = sshll.u32 %s174_s17, 4  ;;  %s29_s18 = int_to_ptr.vmem [resolvable:$true] %s28_s18 }
   0x7   :  { %31 = dma.hbm_to_vmem [thread:$0]  %s27_s16, 16, %s29_s18, [#allocation6]  }
   0x8   :  { %167 = dma.done.wait [#allocation3], 128  }
   0x9   :  { %168 = vsyncadd [#allocation3], 4294967168 }
   0xa   :  { %169 = dma.done.wait [#allocation6], 16  }
   0xb   :  { %170 = vsyncadd [#allocation6], 4294967280  ;;  %v42_v0 = vlaneseq  ;;  %v41_v2 = vld [vmem:[#allocation5] sm:$0x1]  ;;  %v40_v13 = vld [vmem:[#allocation2] sm:$0xff]  ;;  %s175_s0 = smov [#allocation7]  }
   0xc   :  { %v88_v4 = vadd.f32 -1.0, %v41_v2  ;;  %v92_v10 = vld [vmem:[#allocation5] ss:$0 sm:$0xff]  ;;  %s75_s1 = sshll.u32 %s175_s0, 4  ;;  %s77_s21 = sshll.u32 %s202_s2, 4  ;;  %s76_s1 = int_to_ptr.vmem [resolvable:$true] %s75_s1  ;;  %s78_s21 = int_to_ptr.hbm [resolvable:$true] %s77_s21 }
   0xd   :  { %v43_v1 = vshrl.u32 %v42_v0, 7 }
   0xe   :  { %v47_v5 = vperm.slane %v88_v4, 0 }
   0xf   :  { %v44_v3 = vcvt.s32.f32 %v43_v1 }
  0x11   :  { %v49_v6 = vsub.f32 %v47_v5, %v44_v3  ;;  %vm54_vm0 = vcmp.eq.f32.partialorder %v44_v3, 0.0  ;;  %vm60_vm1 = vcmp.lt.f32.partialorder %v44_v3, %v92_v10 }
  0x13   :  { %v50_v7 = vmax.f32 %v49_v6, 0.0 }
  0x15   :  { %v51_v8 = vmul.f32 -1.609438, %v50_v7 }
  0x17   :  { %v52_v9 = vmul.f32 1.442695, %v51_v8 }
  0x19   :  { %93 = vpow2.f32 %v52_v9 }
  0x1f   :  { %v94_v11 = vpop.eup %93 }
  0x20   :  { %v55_v12 = vmul.f32 0.8, %v94_v11 }
  0x22   :  { %v56_v14 = vsel %vm54_vm0, %v94_v11, %v55_v12 }
  0x23   :  { %v61_v15 = vsel %vm60_vm1, %v56_v14, 0.0 }
  0x24   :  { %v62_v16 = vmul.f32 %v61_v15, %v40_v13 }
  0x26   :  { %v63_v17 = vrot.slane %v62_v16, 4 }
  0x28   :  { %v64_v18 = vadd.f32 %v63_v17, %v62_v16 }
  0x2a   :  { %v65_v19 = vrot.slane %v64_v18, 2 }
  0x2c   :  { %v66_v20 = vadd.f32 %v65_v19, %v64_v18 }
  0x2e   :  { %v67_v21 = vrot.slane %v66_v20, 1 }
  0x30   :  { %v68_v22 = vadd.f32 %v67_v21, %v66_v20 }
  0x32   :  { %69 = vst [vmem:[#allocation7] sm:$0x1] %v68_v22 }
  0x33   :  { %80 = dma.vmem_to_hbm [thread:$0]  %s76_s1, 16, %s78_s21, [#allocation4]  }
  0x34   :  { %171 = dma.done.wait [#allocation4], 16  }
  0x35   :  { %172 = vsyncadd [#allocation4], 4294967280 }
  0x36   :  { %85 = vsyncpa [#allocation3], 1 }
  0x37   :  { %86 = vsyncpa [#allocation6], 1 }
  0x38   :  { %87 = vsyncpa [#allocation4], 1 }

</bundles_post_ra>
